<compile_context>
chip_gen: v6e
topology: v6e:2x2x1
jax: 0.10.0
libtpu: 0.0.40
codegen_flags: <defaults>
</compile_context>

<pallas_src>
import functools

import jax
import jax.numpy as jnp
from jax import lax
from jax.experimental import pallas as pl
from jax.experimental.pallas import tpu as pltpu

LANE = 128
MASK_SUBLANE = 32           # int8 output tiling minimum is (32, 128)
MAX_BLOCK_ROWS = 1024       # 1024*128*f32 = 512 KiB/block: ~roofline, fits VMEM easily

# murmur3-finalizer mixing constants, expressed as wrapped (two's-complement) int32.
_GOLD = -1640531527   # 0x9E3779B9
_C1 = -2048144789     # 0x85EBCA6B
_C2 = -1028477387     # 0xC2B2AE35


def _round_up(x, m):
    return ((x + m - 1) // m) * m


def _keep_from_hash(elem_idx, seed, thresh31):
    """Stateless Bernoulli(keep) draw from absolute element index + seed."""
    x = elem_idx * jnp.int32(_GOLD)
    x = x ^ seed
    x = x ^ lax.shift_right_logical(x, jnp.int32(16))
    x = x * jnp.int32(_C1)
    x = x ^ lax.shift_right_logical(x, jnp.int32(13))
    x = x * jnp.int32(_C2)
    x = x ^ lax.shift_right_logical(x, jnp.int32(16))
    r31 = x & jnp.int32(0x7FFFFFFF)           # uniform in [0, 2^31)
    return r31 >= thresh31                    # P(keep) = 1 - dprob


def _sparse_dropout_kernel(seed_ref, val_ref, out_ref, mask_ref, *,
                           scale, thresh31):
    block_rows, lane = val_ref.shape
    base = pl.program_id(0) * jnp.int32(block_rows * lane)
    row = lax.broadcasted_iota(jnp.int32, (block_rows, lane), 0)
    col = lax.broadcasted_iota(jnp.int32, (block_rows, lane), 1)
    elem_idx = base + row * jnp.int32(lane) + col     # absolute, tiling-independent

    keep = _keep_from_hash(elem_idx, seed_ref[0], jnp.int32(thresh31))

    vals = val_ref[...]
    out_ref[...] = jnp.where(keep, vals * scale, jnp.zeros_like(vals))
    mask_ref[...] = keep.astype(jnp.int8)             # int8 mask: 1/4 the i32 traffic


def sparse_dropout(indices, values, dense_shape, seed, dprob=0.5, training=True):
    """JAX/Pallas equivalent of SparseDropout.forward.

    Returns (indices, new_values, keep_mask, dense_shape).
    """
    kprob = 1.0 - dprob
    nnz = values.shape[0]

    if not training or dprob <= 0.0:
        return indices, values, jnp.ones((nnz,), dtype=bool), dense_shape
    if nnz == 0:
        return indices, values, jnp.zeros((0,), dtype=bool), dense_shape
    if dprob >= 1.0:  # kprob == 0: everything dropped; avoid inf scale
        return (indices, jnp.zeros_like(values),
                jnp.zeros((nnz,), dtype=bool), dense_shape)

    thresh31 = min(int(round(dprob * (1 << 31))), (1 << 31) - 1)
    scale = 1.0 / kprob

    rows_needed = pl.cdiv(nnz, LANE)
    block_rows = min(MAX_BLOCK_ROWS,
                     _round_up(max(rows_needed, 1), MASK_SUBLANE))
    padded_rows = _round_up(rows_needed, block_rows)
    padded = padded_rows * LANE
    grid = (padded_rows // block_rows,)

    # TODO(synk): torch additionally compacts indices/values to the kept
    # entries (dynamic nnz); with static shapes we return the keep mask and
    # zeroed dropped values instead (densified result is identical).
    vals2d = jnp.pad(values, (0, padded - nnz)).reshape(padded_rows, LANE)

    out2d, mask2d = pl.pallas_call(
        functools.partial(_sparse_dropout_kernel, scale=scale, thresh31=thresh31),
        out_shape=(
            jax.ShapeDtypeStruct((padded_rows, LANE), values.dtype),
            jax.ShapeDtypeStruct((padded_rows, LANE), jnp.int8),
        ),
        grid_spec=pltpu.PrefetchScalarGridSpec(
            num_scalar_prefetch=1,
            grid=grid,
            in_specs=[pl.BlockSpec((block_rows, LANE), lambda i, seed_r: (i, 0))],
            out_specs=[
                pl.BlockSpec((block_rows, LANE), lambda i, seed_r: (i, 0)),
                pl.BlockSpec((block_rows, LANE), lambda i, seed_r: (i, 0)),
            ],
        ),
        compiler_params=pltpu.CompilerParams(
            dimension_semantics=("parallel",)),  # blocks independent -> 2-TC on v7x
    )(jnp.array([seed], jnp.int32), vals2d)

    new_values = out2d.reshape(-1)[:nnz]
    keep_mask = mask2d.reshape(-1)[:nnz].astype(bool)
    return indices, new_values, keep_mask, dense_shape


def densify(indices, values, dense_shape):
    """Helper: scatter the COO representation into a dense array (plain JAX)."""
    dense = jnp.zeros(dense_shape, dtype=values.dtype)
    return dense.at[tuple(indices)].add(values)


if __name__ == "__main__":
    key = jax.random.PRNGKey(0)
    k_idx, k_val = jax.random.split(key, 2)

    # Sparse tensor over a small dense shape (NCHW-style) [2, 4, 16, 16].
    dense_shape = (2, 4, 16, 16)
    nnz = 300
    maxes = jnp.array(dense_shape, dtype=jnp.int32)[:, None]
    indices = (jax.random.randint(
        k_idx, (len(dense_shape), nnz), 0, 1 << 16, dtype=jnp.int32) % maxes)
    values = jax.random.normal(k_val, (nnz,), dtype=jnp.float32)

    dprob = 0.5
    kprob = 1.0 - dprob
    idx_out, val_out, keep_mask, shp = sparse_dropout(
        indices, values, dense_shape, seed=1234, dprob=dprob, training=True)
    val_out = jax.block_until_ready(val_out)
    keep_mask = jax.block_until_ready(keep_mask)

    # Sanity checks of the dropout semantics.
    assert val_out.shape == values.shape
    # kept entries are scaled by 1/kprob, dropped entries are zero
    assert bool(jnp.allclose(jnp.where(keep_mask, val_out * kprob, 0.0),
                             jnp.where(keep_mask, values, 0.0), atol=1e-6))
    assert bool(jnp.all(jnp.where(keep_mask, True, val_out == 0.0)))
    # keep fraction should be near kprob
    frac = float(jnp.mean(keep_mask.astype(jnp.float32)))
    assert 0.2 < frac < 0.8, f"keep fraction {frac} implausible for kprob=0.5"

    # determinism: same seed -> same mask
    _, val_out2, keep_mask2, _ = sparse_dropout(
        indices, values, dense_shape, seed=1234, dprob=dprob, training=True)
    assert bool(jnp.all(keep_mask == keep_mask2))
    assert bool(jnp.allclose(val_out, val_out2))

    # eval mode: identity
    _, val_eval, _, _ = sparse_dropout(
        indices, values, dense_shape, seed=1234, dprob=dprob, training=False)
    assert bool(jnp.allclose(val_eval, values))

    print("KERNEL_OK")
</pallas_src>

<mosaic_0001>
module attributes {stable_mosaic.version = 11 : i64} {
  func.func @_sparse_dropout_kernel(%arg0: i32, %arg1: memref<1xi32, #tpu.memory_space<smem>>, %arg2: memref<32x128xf32, #tpu.memory_space<vmem>>, %arg3: memref<32x128xf32, #tpu.memory_space<vmem>>, %arg4: memref<32x128xi8, #tpu.memory_space<vmem>>) attributes {dimension_semantics = [#tpu.dimension_semantics<parallel>], iteration_bounds = array<i64: 1>, scalar_prefetch = 1 : i64, scratch_operands = 0 : i64, tpu.core_type = #tpu.core_type<tc>, window_params = [{transform_indices = @transform_0, window_bounds = array<i64: 32, 128>}, {transform_indices = @transform_1, window_bounds = array<i64: 32, 128>}, {transform_indices = @transform_2, window_bounds = array<i64: 32, 128>}]} {
    %c4096_i32 = arith.constant 4096 : i32
    %0 = arith.muli %arg0, %c4096_i32 : i32
    %1 = tpu.iota {dimensions = array<i32: 0>} : vector<32x128xi32>
    %2 = tpu.iota {dimensions = array<i32: 1>} : vector<32x128xi32>
    %c128_i32 = arith.constant 128 : i32
    %3 = vector.broadcast %c128_i32 : i32 to vector<32x128xi32>
    %4 = arith.muli %1, %3 : vector<32x128xi32>
    %5 = vector.broadcast %0 : i32 to vector<32x128xi32>
    %6 = arith.addi %5, %4 : vector<32x128xi32>
    %7 = arith.addi %6, %2 : vector<32x128xi32>
    %c0 = arith.constant 0 : index
    %8 = memref.load %arg1[%c0] : memref<1xi32, #tpu.memory_space<smem>>
    %c-1640531527_i32 = arith.constant -1640531527 : i32
    %9 = vector.broadcast %c-1640531527_i32 : i32 to vector<32x128xi32>
    %10 = arith.muli %7, %9 : vector<32x128xi32>
    %11 = vector.broadcast %8 : i32 to vector<32x128xi32>
    %12 = arith.xori %10, %11 : vector<32x128xi32>
    %c16_i32 = arith.constant 16 : i32
    %13 = vector.broadcast %c16_i32 : i32 to vector<32x128xi32>
    %14 = arith.shrui %12, %13 : vector<32x128xi32>
    %15 = arith.xori %12, %14 : vector<32x128xi32>
    %c-2048144789_i32 = arith.constant -2048144789 : i32
    %16 = vector.broadcast %c-2048144789_i32 : i32 to vector<32x128xi32>
    %17 = arith.muli %15, %16 : vector<32x128xi32>
    %c13_i32 = arith.constant 13 : i32
    %18 = vector.broadcast %c13_i32 : i32 to vector<32x128xi32>
    %19 = arith.shrui %17, %18 : vector<32x128xi32>
    %20 = arith.xori %17, %19 : vector<32x128xi32>
    %c-1028477387_i32 = arith.constant -1028477387 : i32
    %21 = vector.broadcast %c-1028477387_i32 : i32 to vector<32x128xi32>
    %22 = arith.muli %20, %21 : vector<32x128xi32>
    %c16_i32_0 = arith.constant 16 : i32
    %23 = vector.broadcast %c16_i32_0 : i32 to vector<32x128xi32>
    %24 = arith.shrui %22, %23 : vector<32x128xi32>
    %25 = arith.xori %22, %24 : vector<32x128xi32>
    %c2147483647_i32 = arith.constant 2147483647 : i32
    %26 = vector.broadcast %c2147483647_i32 : i32 to vector<32x128xi32>
    %27 = arith.andi %25, %26 : vector<32x128xi32>
    %c1073741824_i32 = arith.constant 1073741824 : i32
    %28 = vector.broadcast %c1073741824_i32 : i32 to vector<32x128xi32>
    %29 = arith.cmpi sge, %27, %28 : vector<32x128xi32>
    %c0_1 = arith.constant 0 : index
    %c0_2 = arith.constant 0 : index
    %30 = vector.load %arg2[%c0_1, %c0_2] : memref<32x128xf32, #tpu.memory_space<vmem>>, vector<32x128xf32>
    %cst = arith.constant 2.000000e+00 : f32
    %31 = vector.broadcast %cst : f32 to vector<32x128xf32>
    %32 = arith.mulf %30, %31 : vector<32x128xf32>
    %cst_3 = arith.constant 0.000000e+00 : f32
    %33 = vector.broadcast %cst_3 : f32 to vector<32x128xf32>
    %34 = arith.select %29, %32, %33 : vector<32x128xi1>, vector<32x128xf32>
    %c0_4 = arith.constant 0 : index
    %c0_5 = arith.constant 0 : index
    %35 = vector.load %arg3[%c0_4, %c0_5] : memref<32x128xf32, #tpu.memory_space<vmem>>, vector<32x128xf32>
    tpu.vector_store %arg3[%c0_4, %c0_5], %34 {strides = array<i32>} : memref<32x128xf32, #tpu.memory_space<vmem>>, vector<32x128xf32>,
    %36 = arith.extui %29 : vector<32x128xi1> to vector<32x128xi8>
    %c0_6 = arith.constant 0 : index
    %c0_7 = arith.constant 0 : index
    %37 = vector.load %arg4[%c0_6, %c0_7] : memref<32x128xi8, #tpu.memory_space<vmem>>, vector<32x128xi8>
    tpu.vector_store %arg4[%c0_6, %c0_7], %36 {strides = array<i32>} : memref<32x128xi8, #tpu.memory_space<vmem>>, vector<32x128xi8>,
    return
  }
  func.func @transform_0(%arg0: i32, %arg1: memref<1xi32, #tpu.memory_space<smem>>) -> (i32, i32) {
    %c0_i32 = arith.constant 0 : i32
    %c0_i32_0 = arith.constant 0 : i32
    return %arg0, %c0_i32 : i32, i32
  }
  func.func @transform_1(%arg0: i32, %arg1: memref<1xi32, #tpu.memory_space<smem>>) -> (i32, i32) {
    %c0_i32 = arith.constant 0 : i32
    %c0_i32_0 = arith.constant 0 : i32
    return %arg0, %c0_i32 : i32, i32
  }
  func.func @transform_2(%arg0: i32, %arg1: memref<1xi32, #tpu.memory_space<smem>>) -> (i32, i32) {
    %c0_i32 = arith.constant 0 : i32
    %c0_i32_0 = arith.constant 0 : i32
    return %arg0, %c0_i32 : i32, i32
  }
}

</mosaic_0001>

<bundles_post_ra>
// kernel: tpu_custom_call.1
= control target key start
LH: loop header
LB: loop body
LE: loop exit
PB: predicated region body
PF: predicated region fallthrough
CT: control target
= control target key end

     0   :  { %10 = vsyncpa [#allocation5], 0  ;;  %s285_s0 = inlined_call_operand.<no memory space> [shape: s32[1], index: 0, kind: input, shape index: {}]   ;;  %s286_s1 = inlined_call_operand.hbm [shape: f32[32,128], index: 1, kind: input, shape index: {}]   ;;  %s287_s2 = inlined_call_operand.hbm [shape: f32[32,128], index: 2, kind: output, shape index: {0}]   ;;  %s288_s3 = inlined_call_operand.hbm [shape: s8[32,128], index: 3, kind: output, shape index: {1}]  }
   0x1   :  { %11 = vsyncpa [#allocation6], 0 }
   0x2   :  { %12 = vsyncpa [#allocation9], 0  ;;  %s225_s12 = smov [#allocation4]  }
   0x3   :  { %s18_s13 = sshll.u32 %s225_s12, 4  ;;  %s19_s13 = int_to_ptr.vmem [resolvable:$true] %s18_s13 }
   0x4   :  { %s167_s14 = scalar_lea.vmem %s19_s13, 512  ;;  %p172_p1 = scmp.lt.s32.totalorder %s19_s13, %s19_s13 }
   0x5   :  { %p168_p0 = scmp.ne.s32.totalorder %s19_s13, %s167_s14  ;;  %p173_p2 = scmp.lt.s32.totalorder %s167_s14, %s167_s14 }
   0x7   :  { %p174_p3 = por %p173_p2, %p172_p1 }
   0x9   :  { %p175_p4 = pnand %p174_p3, %p168_p0 }
   0xb   :  { %178 = shalt.err (!%p175_p4)
}
   0xc   :  { %s226_s15 = smov 128   ;;  %s227_s16 = smov 8  }
   0xd   :  { %24 = dma.hbm_to_vmem [thread:$0]  %s286_s1, 512, %s19_s13, [#allocation5], %s226_s15, %s226_s15, %s227_s16  }
   0xe   :  { %219 = dma.done.wait [#allocation5], 512  }
   0xf   :  { %220 = vsyncadd [#allocation5], 4294966784  ;;  %v31_v0 = vlaneseq  ;;  %v56_v10 = vstv %s285_s0  ;;  %v101_v45 = vld [vmem:[#allocation4] sm:$0xff]  ;;  %v102_v51 = vld [vmem:[#allocation4 + $0x8] sm:$0xff]  ;;  %s228_s0 = smov [#allocation7]   ;;  %s229_s21 = smov [#allocation8]  }
  0x10   :  { %v105_v52 = vmul.f32 2.0, %v101_v45  ;;  %v103_v54 = vld [vmem:[#allocation4 + $0x10] sm:$0xff]  ;;  %v104_v56 = vld [vmem:[#allocation4 + $0x18] sm:$0xff]  ;;  %v106_v59 = vmul.f32 2.0, %v102_v51  ;;  %s127_s1 = sshll.u32 %s228_s0, 4  ;;  %s140_s22 = sshll.u32 %s229_s21, 4  ;;  %s128_s1 = int_to_ptr.vmem [resolvable:$true] %s127_s1  ;;  %s141_s22 = int_to_ptr.vmem [resolvable:$true] %s140_s22 }
  0x11   :  { %v32_v1 = vshrl.u32 %v31_v0, 7  ;;  %v37_v2 = vand.u32 127, %v31_v0  ;;  %v107_v0 = vmul.f32 2.0, %v103_v54  ;;  %s179_s23 = scalar_lea.vmem %s128_s1, 512  ;;  %p184_p6 = scmp.lt.s32.totalorder %s128_s1, %s128_s1 }
  0x12   :  { %p180_p5 = scmp.ne.s32.totalorder %s128_s1, %s179_s23  ;;  %p185_p7 = scmp.lt.s32.totalorder %s179_s23, %s179_s23 }
  0x13   :  { %v38_v3 = vmul.u32 128, %v32_v1  ;;  %v33_v4 = vadd.s32 8, %v32_v1  ;;  %v34_v5 = vadd.s32 16, %v32_v1  ;;  %v35_v6 = vadd.s32 24, %v32_v1 }
  0x14   :  { %v108_v1 = vmul.f32 2.0, %v104_v56  ;;  %p186_p8 = por %p185_p7, %p184_p6 }
  0x15   :  { %v47_v7 = vadd.s32 %v38_v3, %v37_v2  ;;  %v39_v8 = vmul.u32 128, %v33_v4  ;;  %v40_v9 = vmul.u32 128, %v34_v5 }
  0x16   :  { %v41_v11 = vmul.u32 128, %v35_v6  ;;  %p187_p9 = pnand %p186_p8, %p180_p5 }
  0x17   :  { %v52_v12 = vmul.u32 2654435769, %v47_v7  ;;  %v48_v13 = vadd.s32 %v39_v8, %v37_v2  ;;  %v49_v14 = vadd.s32 %v40_v9, %v37_v2  ;;  %v230_v9 = vmov 0  }
  0x18   :  { %v50_v15 = vadd.s32 %v41_v11, %v37_v2 }
  0x19   :  { %v57_v16 = vxor.u32 %v56_v10, %v52_v12  ;;  %v53_v17 = vmul.u32 2654435769, %v48_v13  ;;  %v54_v18 = vmul.u32 2654435769, %v49_v14 }
  0x1a   :  { %v55_v19 = vmul.u32 2654435769, %v50_v15 }
  0x1b   :  { %v61_v20 = vshrl.u32 %v57_v16, 16  ;;  %v58_v21 = vxor.u32 %v56_v10, %v53_v17  ;;  %v59_v22 = vxor.u32 %v56_v10, %v54_v18 }
  0x1c   :  { %v60_v23 = vxor.u32 %v56_v10, %v55_v19 }
  0x1d   :  { %v65_v24 = vxor.u32 %v61_v20, %v57_v16  ;;  %v62_v25 = vshrl.u32 %v58_v21, 16  ;;  %v63_v26 = vshrl.u32 %v59_v22, 16 }
  0x1e   :  { %v64_v27 = vshrl.u32 %v60_v23, 16 }
  0x1f   :  { %v69_v28 = vmul.u32 2246822507, %v65_v24  ;;  %v66_v29 = vxor.u32 %v62_v25, %v58_v21  ;;  %v67_v30 = vxor.u32 %v63_v26, %v59_v22 }
  0x20   :  { %v68_v31 = vxor.u32 %v64_v27, %v60_v23 }
  0x21   :  { %v73_v32 = vshrl.u32 %v69_v28, 13  ;;  %v70_v33 = vmul.u32 2246822507, %v66_v29  ;;  %v71_v34 = vmul.u32 2246822507, %v67_v30 }
  0x22   :  { %v72_v35 = vmul.u32 2246822507, %v68_v31 }
  0x23   :  { %v77_v36 = vxor.u32 %v73_v32, %v69_v28  ;;  %v74_v37 = vshrl.u32 %v70_v33, 13  ;;  %v75_v38 = vshrl.u32 %v71_v34, 13 }
  0x24   :  { %v76_v39 = vshrl.u32 %v72_v35, 13 }
  0x25   :  { %v81_v40 = vmul.u32 3266489909, %v77_v36  ;;  %v78_v41 = vxor.u32 %v74_v37, %v70_v33  ;;  %v79_v42 = vxor.u32 %v75_v38, %v71_v34 }
  0x26   :  { %v80_v43 = vxor.u32 %v76_v39, %v72_v35 }
  0x27   :  { %v85_v44 = vshrl.u32 %v81_v40, 16  ;;  %v82_v46 = vmul.u32 3266489909, %v78_v41  ;;  %v83_v47 = vmul.u32 3266489909, %v79_v42 }
  0x28   :  { %v84_v48 = vmul.u32 3266489909, %v80_v43 }
  0x29   :  { %v89_v49 = vxor.u32 %v85_v44, %v81_v40  ;;  %v86_v50 = vshrl.u32 %v82_v46, 16  ;;  %v87_v53 = vshrl.u32 %v83_v47, 16 }
  0x2a   :  { %v88_v55 = vshrl.u32 %v84_v48, 16 }
  0x2b   :  { %v93_v57 = vand.u32 2147483647, %v89_v49  ;;  %v90_v58 = vxor.u32 %v86_v50, %v82_v46  ;;  %v91_v60 = vxor.u32 %v87_v53, %v83_v47 }
  0x2c   :  { %v92_v61 = vxor.u32 %v88_v55, %v84_v48 }
  0x2d   :  { %vm260_vm0 = vcmp.ge.s32.totalorder %v93_v57, 1073741824  ;;  %v94_v63 = vand.u32 2147483647, %v90_v58  ;;  %v95_v3 = vand.u32 2147483647, %v91_v60 }
  0x2e   :  { %v109_v2 = vsel %vm260_vm0, %v105_v52, 0.0  ;;  %v96_v4 = vand.u32 2147483647, %v92_v61 }
  0x2f   :  { %113 = vst [vmem:[#allocation7] sm:$0xff] %v109_v2  ;;  %vm266_vm1 = vcmp.ge.s32.totalorder %v94_v63, 1073741824  ;;  %vm99_vm2 = vcmp.ge.s32.totalorder %v95_v3, 1073741824 }
  0x30   :  { %v110_v6 = vsel %vm266_vm1, %v106_v59, 0.0  ;;  %vm100_vm3 = vcmp.ge.s32.totalorder %v96_v4, 1073741824  ;;  %vm117_vm4 = vmpackc.low %vm266_vm1, %vm260_vm0  ;;  %v111_v7 = vsel %vm99_vm2, %v107_v0, 0.0 }
  0x31   :  { %114 = vst [vmem:[#allocation7 + $0x8] sm:$0xff] %v110_v6  ;;  %v112_v8 = vsel %vm100_vm3, %v108_v1, 0.0  ;;  %vm118_vm5 = vmpackc.low %vm100_vm3, %vm99_vm2 }
  0x32   :  { %115 = vst [vmem:[#allocation7 + $0x10] sm:$0xff] %v111_v7  ;;  %116 = vst [vmem:[#allocation7 + $0x18] sm:$0xff] %v112_v8 }
  0x33   :  { %vm119_vm6 = vmpackc.even %vm118_vm5, %vm117_vm4 }
  0x34   :  { %v120_v10 = vsel %vm119_vm6, 16843009, %v230_v9 }
  0x35   :  { %190 = shalt.err (!%p187_p9)
}
  0x36   :  { %133 = dma.vmem_to_hbm [thread:$0]  %s128_s1, 512, %s287_s2, [#allocation6], %s226_s15, %s226_s15, %s227_s16   ;;  %121 = vst [vmem:[#allocation8] sm:$0xff] %v120_v10 }
  0x37   :  { %s199_s26 = scalar_lea.vmem %s141_s22, 128  ;;  %p204_p11 = scmp.lt.s32.totalorder %s141_s22, %s141_s22 }
  0x38   :  { %p200_p10 = scmp.ne.s32.totalorder %s141_s22, %s199_s26  ;;  %p205_p12 = scmp.lt.s32.totalorder %s199_s26, %s199_s26 }
  0x3a   :  { %p206_p13 = por %p205_p12, %p204_p11 }
  0x3c   :  { %p207_p0 = pnand %p206_p13, %p200_p10 }
  0x3e   :  { %210 = shalt.err (!%p207_p0)
}
  0x3f   :  { %143 = dma.vmem_to_hbm [thread:$0]  %s141_s22, 128, %s288_s3, [#allocation9]  }
  0x40   :  { %221 = dma.done.wait [#allocation6], 512  }
  0x41   :  { %222 = vsyncadd [#allocation6], 4294966784 }
  0x42   :  { %223 = dma.done.wait [#allocation9], 128  }
  0x43   :  { %224 = vsyncadd [#allocation9], 4294967168 }
  0x44   :  { %150 = vsyncpa [#allocation5], 1 }
  0x45   :  { %151 = vsyncpa [#allocation6], 1 }
  0x46   :  { %152 = vsyncpa [#allocation9], 1 }

</bundles_post_ra>
